<compile_context>
chip_gen: v7x
topology: tpu7x:2x2x1
jax: 0.10.0
libtpu: 0.0.40
codegen_flags: <defaults>
</compile_context>

<pallas_src>
import jax
import jax.numpy as jnp
from jax.experimental import pallas as pl
from jax.experimental.pallas import tpu as pltpu


# ----------------------------------------------------------------------------- kernel
def _drop_path_kernel(scale_ref, x_ref, o_ref):
    # scale_ref: (TB, 1)   x_ref / o_ref: (TB, TN)
    # scale dtype is chosen in the wrapper (f32 for f32 inputs, native for bf16/fp16/fp8),
    # so this is a single broadcasted VPU multiply per tile.
    o_ref[...] = (x_ref[...] * scale_ref[...]).astype(o_ref.dtype)


# ------------------------------------------------------------------------ tile sizing
def _largest_dividing(dim: int, unit: int, cap: int) -> int:
    """Largest multiple of `unit` that divides `dim` and is <= cap.

    Precondition: dim % unit == 0 (so `unit` itself is always a valid answer).
    """
    cap = max(unit, min(dim, cap))
    cap -= cap % unit
    t = cap
    while t > unit and dim % t != 0:
        t -= unit
    return t


def _tile_budget_and_vmem_limit():
    """Per-tile byte budget and explicit VMEM limit, derived from the chip's VMEM."""
    default_vmem = 64 * 1024 * 1024
    try:
        vmem_cap = int(pltpu.get_tpu_info().vmem_capacity_bytes)
    except Exception:  # pragma: no cover - conservative fallback (interpret mode, etc.)
        vmem_cap = default_vmem
    # 2 input + 2 output pipeline buffers must fit with headroom: cap the tile at
    # ~(2/3 * VMEM) / 4, and never above 8 MiB (plenty to amortize the 0.35us/step cost).
    tile_budget = min(8 * 1024 * 1024, max(512 * 1024, (vmem_cap * 2 // 3) // 4))
    # Explicit limit: v5e's scoped default (16 MiB) would reject 4 x multi-MiB buffers.
    vmem_limit = min(vmem_cap, max(32 * 1024 * 1024, 6 * tile_budget))
    return tile_budget, vmem_limit


def _pick_tiles(B: int, N: int, itemsize: int, tile_budget: int):
    """Pick (TB, TN): sublane tile first, then lane tile from the remaining byte budget."""
    sub_unit = max(8, 32 // max(itemsize, 1))   # 8 for f32, 16 for bf16, 32 for int8/fp8
    lane_unit = 128

    # Largest TB for which even the thinnest lane-dense tile (TN = 128) fits the budget.
    tb_budget_cap = max(1, tile_budget // (lane_unit * itemsize))

    if B <= tb_budget_cap:
        if B % sub_unit == 0:
            TB = _largest_dividing(B, sub_unit, min(B, 256, tb_budget_cap))
        else:
            TB = B  # full-extent sublane dim: always legal, and fits the budget
    else:
        # Guard: the full batch would blow the per-tile budget even at TN=128.
        # Use an aligned, possibly non-dividing tile (one masked edge block).
        TB = max(sub_unit, tb_budget_cap - tb_budget_cap % sub_unit)
        if B % sub_unit == 0:
            TB = _largest_dividing(B, sub_unit, TB)

    # Lane tile from the remaining byte budget (instead of a fixed cap).
    tn_budget = max(lane_unit,
                    (tile_budget // (TB * itemsize)) // lane_unit * lane_unit)
    if N % lane_unit == 0:
        TN = _largest_dividing(N, lane_unit, min(N, tn_budget))
    elif TB * N * itemsize <= tile_budget:
        TN = N  # full-extent lane dim fits the budget
    else:
        TN = tn_budget  # aligned non-dividing tile; one masked edge block

    # Never let the grid collapse to a single step on a non-trivial tensor: v7x has two
    # TensorCores sharing the chip, so keep >= 2 steps along the (parallel) lane axis.
    total_bytes = B * N * itemsize
    if (pl.cdiv(B, TB) * pl.cdiv(N, TN) == 1
            and total_bytes >= 512 * 1024
            and N >= 2 * lane_unit):
        if N % lane_unit == 0:
            TN = _largest_dividing(N, lane_unit, max(lane_unit, (N // 2)))
        else:
            TN = max(lane_unit,
                     -(-((N + 1) // 2) // lane_unit) * lane_unit)  # ceil to 128

    return TB, TN


# ----------------------------------------------------------------------------- wrapper
def drop_path_pallas(x, drop_prob: float = 0.0, training: bool = False, *,
                     key=None, donate_x: bool = False):
    """Pallas implementation of DropPath.forward(x)."""
    if drop_prob is None or drop_prob == 0.0 or not training:
        return x
    if not 0.0 <= float(drop_prob) <= 1.0:
        raise ValueError(f"drop_prob must be in [0, 1], got {drop_prob}")
    if drop_prob == 1.0:                       # keep_prob == 0: every path dropped
        return jnp.zeros_like(x)
    assert key is not None, "need a PRNG key when drop_prob > 0 and training"

    keep_prob = 1.0 - float(drop_prob)
    orig_shape = x.shape
    B = orig_shape[0]
    xf = x.reshape(B, -1)
    N = xf.shape[1]
    itemsize = jnp.dtype(xf.dtype).itemsize

    # Per-sample scale: floor(keep_prob + U[0,1)) / keep_prob  in {0, 1/keep_prob}.
    # Computed in f32; for sub-32-bit float inputs it is cast once here so the kernel
    # multiplies in the native dtype (no per-tile f32 upcast / vreg doubling).
    rand = jax.random.uniform(key, (B,), dtype=jnp.float32)
    scale_f32 = (jnp.floor(keep_prob + rand) / keep_prob).reshape(B, 1)
    if jnp.issubdtype(xf.dtype, jnp.floating) and itemsize < 4:
        scale = scale_f32.astype(xf.dtype)
    else:
        scale = scale_f32

    tile_budget, vmem_limit = _tile_budget_and_vmem_limit()
    TB, TN = _pick_tiles(B, N, itemsize, tile_budget)
    grid = (pl.cdiv(B, TB), pl.cdiv(N, TN))

    out = pl.pallas_call(
        _drop_path_kernel,
        out_shape=jax.ShapeDtypeStruct((B, N), x.dtype),
        grid_spec=pltpu.PrefetchScalarGridSpec(
            num_scalar_prefetch=0,
            grid=grid,
            in_specs=[
                pl.BlockSpec((TB, 1), lambda i, j: (i, 0)),    # per-sample scale column
                pl.BlockSpec((TB, TN), lambda i, j: (i, j)),   # dense x tile
            ],
            out_specs=pl.BlockSpec((TB, TN), lambda i, j: (i, j)),
        ),
        compiler_params=pltpu.CompilerParams(
            dimension_semantics=("parallel", "parallel"),
            vmem_limit_bytes=vmem_limit,
        ),
        # Donate x's buffer into the output when the caller no longer needs x.
        input_output_aliases=({1: 0} if donate_x else {}),
    )(scale, xf)

    return out.reshape(orig_shape)


class DropPath:
    """Mirror of the PyTorch DropPath module (stateless; no parameters)."""

    def __init__(self, drop_prob=None):
        self.drop_prob = drop_prob
        self.training = True

    def __call__(self, x, *, key=None):
        return drop_path_pallas(x, self.drop_prob or 0.0, self.training, key=key)


# --------------------------------------------------------------------------- reference
def _reference(x, drop_prob, key):
    keep_prob = 1.0 - drop_prob
    rand = jax.random.uniform(key, (x.shape[0],), dtype=jnp.float32)
    mask = jnp.floor(keep_prob + rand).reshape((-1,) + (1,) * (x.ndim - 1))
    return (x.astype(jnp.float32) / keep_prob * mask).astype(x.dtype)


if __name__ == "__main__":
    key = jax.random.PRNGKey(0)
    k_x1, k_x2, k_x3, k_x4, k_drop = jax.random.split(key, 5)

    module = DropPath(drop_prob=0.3)
    module.training = True

    # 1) Small NCHW input consistent with how DropPath sits inside attention blocks.
    #    B=2 (< 8) -> full-batch sublane block; N=1024 -> single dense lane block.
    x1 = jax.random.normal(k_x1, (2, 4, 16, 16), dtype=jnp.float32)
    y1 = jax.block_until_ready(module(x1, key=k_drop))
    ref1 = _reference(x1, 0.3, k_drop)
    assert jnp.allclose(y1, ref1, atol=1e-6, rtol=1e-5)

    # 2) B=8 with a feature size that is NOT a multiple of 128 (full-extent lane block).
    x2 = jax.random.normal(k_x2, (8, 3, 10, 10), dtype=jnp.float32)
    y2 = jax.block_until_ready(module(x2, key=k_drop))
    ref2 = _reference(x2, 0.3, k_drop)
    assert jnp.allclose(y2, ref2, atol=1e-6, rtol=1e-5)

    # 3) Shape large enough to trigger the "keep >= 2 lane blocks" split (grid=(1,2)).
    x3 = jax.random.normal(k_x3, (16, 8, 32, 32), dtype=jnp.float32)
    y3 = jax.block_until_ready(module(x3, key=k_drop))
    ref3 = _reference(x3, 0.3, k_drop)
    assert jnp.allclose(y3, ref3, atol=1e-6, rtol=1e-5)

    # 4) bf16 input exercises the dtype-aware sublane unit and native-dtype multiply.
    x4 = jax.random.normal(k_x4, (4, 8, 16), dtype=jnp.float32).astype(jnp.bfloat16)
    y4 = jax.block_until_ready(module(x4, key=k_drop))
    ref4 = _reference(x4, 0.3, k_drop)
    assert jnp.allclose(y4.astype(jnp.float32), ref4.astype(jnp.float32),
                        atol=3e-2, rtol=3e-2)

    # Eval mode (or drop_prob == 0) must be the identity.
    module.training = False
    y_eval = jax.block_until_ready(module(x1, key=k_drop))
    assert jnp.array_equal(y_eval, x1)

    print("KERNEL_OK")
</pallas_src>

<mosaic_0001>
module attributes {stable_mosaic.version = 11 : i64} {
  func.func @_drop_path_kernel(%arg0: i32, %arg1: i32, %arg2: memref<2x1xf32, #tpu.memory_space<vmem>>, %arg3: memref<2x1024xf32, #tpu.memory_space<vmem>>, %arg4: memref<2x1024xf32, #tpu.memory_space<vmem>>) attributes {dimension_semantics = [#tpu.dimension_semantics<parallel>, #tpu.dimension_semantics<parallel>], iteration_bounds = array<i64: 1, 1>, scalar_prefetch = 0 : i64, scratch_operands = 0 : i64, tpu.core_type = #tpu.core_type<tc>, window_params = [{transform_indices = @transform_0, window_bounds = array<i64: 2, 1>}, {transform_indices = @transform_1, window_bounds = array<i64: 2, 1024>}, {transform_indices = @transform_2, window_bounds = array<i64: 2, 1024>}]} {
    %c0 = arith.constant 0 : index
    %c0_0 = arith.constant 0 : index
    %0 = vector.load %arg3[%c0, %c0_0] : memref<2x1024xf32, #tpu.memory_space<vmem>>, vector<2x1024xf32>
    %c0_1 = arith.constant 0 : index
    %c0_2 = arith.constant 0 : index
    %1 = vector.load %arg2[%c0_1, %c0_2] : memref<2x1xf32, #tpu.memory_space<vmem>>, vector<2x1xf32>
    %2 = vector.broadcast %1 : vector<2x1xf32> to vector<2x1024xf32>
    %3 = arith.mulf %0, %2 : vector<2x1024xf32>
    %c0_3 = arith.constant 0 : index
    %c0_4 = arith.constant 0 : index
    %4 = vector.load %arg4[%c0_3, %c0_4] : memref<2x1024xf32, #tpu.memory_space<vmem>>, vector<2x1024xf32>
    tpu.vector_store %arg4[%c0_3, %c0_4], %3 {strides = array<i32>} : memref<2x1024xf32, #tpu.memory_space<vmem>>, vector<2x1024xf32>,
    return
  }
  func.func @transform_0(%arg0: i32, %arg1: i32) -> (i32, i32) {
    %c0_i32 = arith.constant 0 : i32
    %c0_i32_0 = arith.constant 0 : i32
    return %arg0, %c0_i32 : i32, i32
  }
  func.func @transform_1(%arg0: i32, %arg1: i32) -> (i32, i32) {
    %c0_i32 = arith.constant 0 : i32
    return %arg0, %arg1 : i32, i32
  }
  func.func @transform_2(%arg0: i32, %arg1: i32) -> (i32, i32) {
    %c0_i32 = arith.constant 0 : i32
    return %arg0, %arg1 : i32, i32
  }
}

</mosaic_0001>

<bundles_post_ra>
// kernel: tpu_custom_call.1
= control target key start
LH: loop header
LB: loop body
LE: loop exit
PB: predicated region body
PF: predicated region fallthrough
CT: control target
= control target key end

     0   :  { %7 = vsyncpa [#allocation3], 0  ;;  %s157_s0 = inlined_call_operand.vmem [shape: f32[2,1], index: 0, kind: input, shape index: {}]   ;;  %s158_s1 = inlined_call_operand.hbm [shape: f32[2,1024], index: 1, kind: input, shape index: {}]   ;;  %s159_s2 = inlined_call_operand.hbm [shape: f32[2,1024], index: 2, kind: output, shape index: {}]  }
   0x1   :  { %8 = vsyncpa [#allocation4], 0  ;;  %s111_s9 = smov [#allocation2]   ;;  %s63_s13 = scalar_lea.hbm %s158_s1, 256 }
   0x2   :  { %s17_s10 = sshll.u32 %s111_s9, 4  ;;  %p64_p0 = scmp.ne.s32.totalorder %s158_s1, %s63_s13  ;;  %s18_s10 = int_to_ptr.vmem [resolvable:$true] %s17_s10 }
   0x3   :  { %p67_p1 = scmp.lt.u32.totalorder %s63_s13, %s158_s1 }
   0x5   :  { %p69_p2 = pnand %p67_p1, %p64_p0 }
   0x7   :  { %72 = shalt.err (!%p69_p2)
}
   0x8   :  { %s73_s18 = scalar_lea.vmem %s18_s10, 256  ;;  %p78_p4 = scmp.lt.s32.totalorder %s18_s10, %s18_s10 }
   0x9   :  { %p74_p3 = scmp.ne.s32.totalorder %s18_s10, %s73_s18  ;;  %p79_p5 = scmp.lt.s32.totalorder %s73_s18, %s73_s18 }
   0xb   :  { %p80_p6 = por %p79_p5, %p78_p4 }
   0xd   :  { %p81_p7 = pnand %p80_p6, %p74_p3 }
   0xf   :  { %84 = shalt.err (!%p81_p7)
}
  0x10   :  { %20 = dma.hbm_to_vmem [thread:$0]  %s158_s1, 256, %s18_s10, [#allocation3]  }
  0x11   :  { %107 = dma.done.wait [#allocation3], 256  }
  0x12   :  { %108 = vsyncadd [#allocation3], 4294967040  ;;  %v112_v0 = vmov 0   ;;  %v26_v1 = vld [vmem:[%s157_s0] sm:$0x3]  ;;  %v34_v4 = vlaneseq  ;;  %v25_v10 = vld [vmem:[#allocation2 + $0x8] sm:$0xff] }
  0x13   :  { %62 = vset.pattern.permute.xlu0 %v112_v0  ;;  %v113_v2 = vmov 269488144   ;;  %v24_v9 = vld [vmem:[#allocation2] sm:$0xff]  ;;  %s114_s23 = smov [#allocation5]  }
  0x14   :  { %29 = vperm.xlu0 %62, %v26_v1   ;;  %v32_v3 = vunpack.c.l.s4 %v113_v2  ;;  %v35_v6 = vshrl.u32 %v34_v4, 7  ;;  %s49_s1 = sshll.u32 %s114_s23, 4  ;;  %s50_s1 = int_to_ptr.vmem [resolvable:$true] %s49_s1 }
  0x15   :  { %s85_s24 = scalar_lea.vmem %s50_s1, 256  ;;  %p90_p9 = scmp.lt.s32.totalorder %s50_s1, %s50_s1 }
  0x16   :  { %v33_v5 = vunpack.c.0.s8 %v32_v3  ;;  %p86_p8 = scmp.ne.s32.totalorder %s50_s1, %s85_s24  ;;  %p91_p10 = scmp.lt.s32.totalorder %s85_s24, %s85_s24 }
  0x18   :  { %v36_v7 = vsub.s32 %v33_v5, %v35_v6  ;;  %p92_p11 = por %p91_p10, %p90_p9 }
  0x1a   :  { %p93_p12 = pnand %p92_p11, %p86_p8 }
  0x93   :  { %v30_v8 = vpop.permute.xlu0 %29 }
  0x94   :  { %v37_v11 = vrot.slane %v30_v8, %v36_v7 }
  0x96   :  { %v39_v12 = vmul.f32 %v37_v11, %v24_v9  ;;  %v40_v13 = vmul.f32 %v37_v11, %v25_v10 }
  0x98   :  { %41 = vst [vmem:[#allocation5] sm:$0xff] %v39_v12  ;;  %42 = vst [vmem:[#allocation5 + $0x8] sm:$0xff] %v40_v13 }
  0x99   :  { %96 = shalt.err (!%p93_p12)
}
  0x9a   :  { %s97_s26 = scalar_lea.hbm %s159_s2, 256 }
  0x9b   :  { %p98_p13 = scmp.ne.s32.totalorder %s159_s2, %s97_s26  ;;  %p101_p0 = scmp.lt.u32.totalorder %s97_s26, %s159_s2 }
  0x9d   :  { %p103_p1 = pnand %p101_p0, %p98_p13 }
  0x9f   :  { %106 = shalt.err (!%p103_p1)
}
  0xa0   :  { %52 = dma.vmem_to_hbm [thread:$0]  %s50_s1, 256, %s159_s2, [#allocation4]  }
  0xa1   :  { %109 = dma.done.wait [#allocation4], 256  }
  0xa2   :  { %110 = vsyncadd [#allocation4], 4294967040 }
  0xa3   :  { %56 = vsyncpa [#allocation3], 1 }
  0xa4   :  { %57 = vsyncpa [#allocation4], 1 }

</bundles_post_ra>
